<compile_context>
chip_gen: v7x
topology: tpu7x:2x2x1
jax: 0.10.0
libtpu: 0.0.40
codegen_flags: <defaults>
</compile_context>

<pallas_src>
import jax
import jax.numpy as jnp
from jax.experimental import pallas as pl
from jax.experimental.pallas import tpu as pltpu


# ----------------------------------------------------------------------------
# Kernel: tiled matmul with resident output accumulator + fused bias/sigmoid.
# Grid = (M/tm, N/tn, K/tk), reduction axis last ("arbitrary").
# ----------------------------------------------------------------------------
def linear_sigmoid_kernel(x_ref, w_ref, b_ref, o_ref):
    k = pl.program_id(2)

    partial = jnp.dot(x_ref[...], w_ref[...], preferred_element_type=jnp.float32)

    @pl.when(k == 0)
    def _first():
        o_ref[...] = partial          # direct store: no zero-fill pass

    @pl.when(k > 0)
    def _accumulate():
        o_ref[...] += partial         # output block stays resident across k

    @pl.when(k == pl.num_programs(2) - 1)
    def _epilogue():
        # Torch row-wise bias: row i gets b[i].  b_ref is a (tm, 128) strip with
        # the row value replicated across lanes; take lane 0 and broadcast (VPU),
        # sigmoid on the EUP.
        y = o_ref[...] + b_ref[:, 0:1]
        o_ref[...] = jax.nn.sigmoid(y).astype(o_ref.dtype)


# ----------------------------------------------------------------------------
# Helpers
# ----------------------------------------------------------------------------
def _round_up(v, m):
    return (v + m - 1) // m * m


def _cdiv(a, b):
    return (a + b - 1) // b


def _pick_tile(dim, cap, align):
    """Aligned tile <= ~cap, balanced so padding waste is minimized."""
    dim_al = _round_up(max(dim, 1), align)
    if dim_al <= cap:
        return dim_al
    n_tiles = _cdiv(dim_al, cap)
    return _round_up(_cdiv(dim_al, n_tiles), align)


def _device_tuning():
    """(tm_cap, tn_cap, tk_cap, vmem_limit_bytes, two_tensorcores)."""
    try:
        kind = jax.devices()[0].device_kind.lower()
    except Exception:  # pragma: no cover - defensive
        kind = ""
    if "v5" in kind:   # v5e: ridge ~240 f/B, 128 MiB VMEM (scoped default 16 MiB)
        return 512, 512, 2048, 64 * 1024 * 1024, False
    if "v6" in kind:   # v6e: ridge ~680 f/B, 128 MiB VMEM
        return 1024, 1024, 1024, 100 * 1024 * 1024, False
    if "v7" in kind:   # v7x: ridge ~311 f/B, 64 MiB VMEM, 2 TensorCores
        return 768, 768, 1024, 48 * 1024 * 1024, True
    # Unknown generation: conservative (matches previously-clean settings).
    return 512, 512, 1024, 32 * 1024 * 1024, False


# ----------------------------------------------------------------------------
# Module wrapper: pads/casts the weight ONCE, builds a thin bias strip per call.
# ----------------------------------------------------------------------------
class PallasLinear:
    def __init__(self, w, b, *, force_pallas=False):
        K, N = w.shape
        assert b.shape == (N, 1), "bias must be (out_features, 1) as in the torch module"
        self.K, self.N = K, N
        self.w = w
        self.b = b
        self.force_pallas = force_pallas

        (self.tm_cap, tn_cap, tk_cap,
         self.vmem_limit, self.two_cores) = _device_tuning()

        # bf16 MXU inputs (f32 accumulation via preferred_element_type) once the
        # GEMM is big enough to matter; f32 MXU matmul is a ~3x slower multipass
        # and doubles x/w HBM bytes.  Tiny (demo) shapes stay exact f32.
        self.mxu_dtype = jnp.bfloat16 if (K * N) >= 128 * 128 else jnp.float32

        self.tn = _pick_tile(N, tn_cap, 128)
        self.tk = _pick_tile(K, tk_cap, 128)
        self.N_pad = _round_up(N, self.tn)
        self.K_pad = _round_up(K, self.tk)

        # Pre-pad + pre-cast the weight once (not on every forward).
        w_c = w.astype(self.mxu_dtype)
        if (self.K_pad, self.N_pad) != (K, N):
            w_c = (jnp.zeros((self.K_pad, self.N_pad), self.mxu_dtype)
                   .at[:K, :N].set(w_c))
        self.w_p = w_c

    def __call__(self, x):
        M, K = x.shape
        assert K == self.K, "contraction mismatch"
        # Torch semantics: (B, O) + (O, 1) broadcast requires B == O.
        assert M == self.N, (
            "torch-style (B,O)+(O,1) bias broadcast requires batch == output_features")

        # Small-problem fast path: Pallas fixed overhead dominates, plain XLA
        # fusion is strictly faster.
        if (not self.force_pallas) and (2 * M * self.N * K) < (1 << 22):
            return jax.nn.sigmoid(x @ self.w + self.b)

        m_align = 16 if self.mxu_dtype == jnp.bfloat16 else 8
        tm = _pick_tile(M, self.tm_cap, m_align)

        # v7x has 2 TensorCores: make sure the parallel grid has >= 2 tiles.
        if (self.two_cores and (self.N_pad // self.tn) == 1
                and _cdiv(M, tm) == 1 and tm >= 2 * m_align):
            tm = _round_up(_cdiv(tm, 2), m_align)

        M_pad = _round_up(M, tm)

        x_p = x.astype(self.mxu_dtype)
        if (M_pad, self.K_pad) != (M, K):
            x_p = (jnp.zeros((M_pad, self.K_pad), self.mxu_dtype)
                   .at[:M, :K].set(x_p))

        # Thin lane-dense bias strip: row i carries b[i] (replicated over lanes).
        b_rows = self.b[:, 0].astype(jnp.float32)                      # (O,) == (M,)
        b_strip = (jnp.zeros((M_pad, 128), jnp.float32)
                   .at[:M, :].set(jnp.broadcast_to(b_rows[:, None], (M, 128))))

        grid = (M_pad // tm, self.N_pad // self.tn, self.K_pad // self.tk)

        bytes_accessed = int(
            x_p.size * x_p.dtype.itemsize
            + self.w_p.size * self.w_p.dtype.itemsize
            + b_strip.size * 4
            + M_pad * self.N_pad * 4)
        cost = pl.CostEstimate(
            flops=2 * M_pad * self.N_pad * self.K_pad,
            transcendentals=M_pad * self.N_pad,       # sigmoid -> exp on the EUP
            bytes_accessed=bytes_accessed)

        grid_spec = pltpu.PrefetchScalarGridSpec(
            num_scalar_prefetch=0,
            grid=grid,
            in_specs=[
                pl.BlockSpec((tm, self.tk), lambda i, j, k: (i, k)),
                # If a v6e profile shows exposed DMA on W (huge N, small K),
                # add pipeline_mode=pl.Buffered(3) here.
                pl.BlockSpec((self.tk, self.tn), lambda i, j, k: (k, j)),
                pl.BlockSpec((tm, 128), lambda i, j, k: (i, 0)),
            ],
            out_specs=pl.BlockSpec((tm, self.tn), lambda i, j, k: (i, j)),
        )

        out_p = pl.pallas_call(
            linear_sigmoid_kernel,
            out_shape=jax.ShapeDtypeStruct((M_pad, self.N_pad), jnp.float32),
            grid_spec=grid_spec,
            compiler_params=pltpu.CompilerParams(
                dimension_semantics=("parallel", "parallel", "arbitrary"),
                vmem_limit_bytes=self.vmem_limit,
            ),
            cost_estimate=cost,
        )(x_p, self.w_p, b_strip)

        return out_p[:M, :self.N]


# ----------------------------------------------------------------------------
# Demo / correctness check
# ----------------------------------------------------------------------------
if __name__ == "__main__":
    input_features = 32
    output_features = 8
    batch = 8  # must equal output_features for torch's (B,O)+(O,1) broadcast

    key = jax.random.PRNGKey(0)
    kx, kw, kb = jax.random.split(key, 3)

    # Deterministic params mirroring torch.rand (uniform [0, 1)).
    w = jax.random.uniform(kw, (input_features, output_features), dtype=jnp.float32)
    b = jax.random.uniform(kb, (output_features, 1), dtype=jnp.float32)
    x = jax.random.uniform(kx, (batch, input_features), dtype=jnp.float32)

    # force_pallas=True so the kernel path (not the small-problem XLA fast path)
    # is exercised at this toy size.
    layer = PallasLinear(w, b, force_pallas=True)
    out = jax.block_until_ready(layer(x))

    # Pure-JAX reference (same broadcasting semantics as torch).
    ref = jax.nn.sigmoid(x @ w + b)
    assert out.shape == (batch, output_features)
    assert jnp.allclose(out, ref, atol=1e-5), "mismatch vs reference"

    print("KERNEL_OK")
</pallas_src>

<mosaic_0001>
module attributes {stable_mosaic.version = 11 : i64} {
  func.func @linear_sigmoid_kernel(%arg0: i32, %arg1: i32, %arg2: i32, %arg3: memref<8x128xf32, #tpu.memory_space<vmem>>, %arg4: memref<128x128xf32, #tpu.memory_space<vmem>>, %arg5: memref<8x128xf32, #tpu.memory_space<vmem>>, %arg6: memref<8x128xf32, #tpu.memory_space<vmem>>) attributes {dimension_semantics = [#tpu.dimension_semantics<parallel>, #tpu.dimension_semantics<parallel>, #tpu.dimension_semantics<arbitrary>], iteration_bounds = array<i64: 1, 1, 1>, scalar_prefetch = 0 : i64, scratch_operands = 0 : i64, tpu.core_type = #tpu.core_type<tc>, window_params = [{transform_indices = @transform_0, window_bounds = array<i64: 8, 128>}, {transform_indices = @transform_1, window_bounds = array<i64: 128, 128>}, {transform_indices = @transform_2, window_bounds = array<i64: 8, 128>}, {transform_indices = @transform_3, window_bounds = array<i64: 8, 128>}]} {
    %c0 = arith.constant 0 : index
    %c0_0 = arith.constant 0 : index
    %0 = vector.load %arg3[%c0, %c0_0] : memref<8x128xf32, #tpu.memory_space<vmem>>, vector<8x128xf32>
    %c0_1 = arith.constant 0 : index
    %c0_2 = arith.constant 0 : index
    %1 = vector.load %arg4[%c0_1, %c0_2] : memref<128x128xf32, #tpu.memory_space<vmem>>, vector<128x128xf32>
    %cst = arith.constant dense<0.000000e+00> : vector<8x128xf32>
    %2 = tpu.matmul %0, %1, %cst {dimension_numbers = #tpu.dot_dimension_numbers<[1], [0], [0], [1], [0, 0, 1, 1], [], []>} : vector<8x128xf32>, vector<128x128xf32>, vector<8x128xf32> -> vector<8x128xf32>
    %c0_i32 = arith.constant 0 : i32
    %3 = arith.cmpi eq, %arg2, %c0_i32 : i32
    %4 = arith.extui %3 : i1 to i32
    %c0_i32_3 = arith.constant 0 : i32
    %5 = arith.cmpi ne, %4, %c0_i32_3 : i32
    scf.if %5 {
      %c0_8 = arith.constant 0 : index
      %c0_9 = arith.constant 0 : index
      %12 = vector.load %arg6[%c0_8, %c0_9] : memref<8x128xf32, #tpu.memory_space<vmem>>, vector<8x128xf32>
      tpu.vector_store %arg6[%c0_8, %c0_9], %2 {strides = array<i32>} : memref<8x128xf32, #tpu.memory_space<vmem>>, vector<8x128xf32>,
    } else {
    }
    %c0_i32_4 = arith.constant 0 : i32
    %6 = arith.cmpi sgt, %arg2, %c0_i32_4 : i32
    %7 = arith.extui %6 : i1 to i32
    %c0_i32_5 = arith.constant 0 : i32
    %8 = arith.cmpi ne, %7, %c0_i32_5 : i32
    scf.if %8 {
      %c0_8 = arith.constant 0 : index
      %c0_9 = arith.constant 0 : index
      %12 = vector.load %arg6[%c0_8, %c0_9] : memref<8x128xf32, #tpu.memory_space<vmem>>, vector<8x128xf32>
      %13 = arith.addf %12, %2 : vector<8x128xf32>
      %c0_10 = arith.constant 0 : index
      %c0_11 = arith.constant 0 : index
      %14 = vector.load %arg6[%c0_10, %c0_11] : memref<8x128xf32, #tpu.memory_space<vmem>>, vector<8x128xf32>
      tpu.vector_store %arg6[%c0_10, %c0_11], %13 {strides = array<i32>} : memref<8x128xf32, #tpu.memory_space<vmem>>, vector<8x128xf32>,
    } else {
    }
    %c0_i32_6 = arith.constant 0 : i32
    %9 = arith.cmpi eq, %arg2, %c0_i32_6 : i32
    %10 = arith.extui %9 : i1 to i32
    %c0_i32_7 = arith.constant 0 : i32
    %11 = arith.cmpi ne, %10, %c0_i32_7 : i32
    scf.if %11 {
      %c0_8 = arith.constant 0 : index
      %c0_9 = arith.constant 0 : index
      %12 = vector.load %arg6[%c0_8, %c0_9] : memref<8x128xf32, #tpu.memory_space<vmem>>, vector<8x128xf32>
      %c0_10 = arith.constant 0 : index
      %c0_11 = arith.constant 0 : index
      %13 = vector.load %arg5[%c0_10, %c0_11] : memref<8x128xf32, #tpu.memory_space<vmem>>, vector<8x1xf32>
      %14 = vector.broadcast %13 : vector<8x1xf32> to vector<8x128xf32>
      %15 = arith.addf %12, %14 : vector<8x128xf32>
      %16 = arith.negf %15 : vector<8x128xf32>
      %17 = math.exp %16 : vector<8x128xf32>
      %cst_12 = arith.constant 1.000000e+00 : f32
      %18 = vector.broadcast %cst_12 : f32 to vector<8x128xf32>
      %19 = arith.addf %18, %17 : vector<8x128xf32>
      %20 = arith.divf %18, %19 : vector<8x128xf32>
      %c0_13 = arith.constant 0 : index
      %c0_14 = arith.constant 0 : index
      %21 = vector.load %arg6[%c0_13, %c0_14] : memref<8x128xf32, #tpu.memory_space<vmem>>, vector<8x128xf32>
      tpu.vector_store %arg6[%c0_13, %c0_14], %20 {strides = array<i32>} : memref<8x128xf32, #tpu.memory_space<vmem>>, vector<8x128xf32>,
    } else {
    }
    return
  }
  func.func @transform_0(%arg0: i32, %arg1: i32, %arg2: i32) -> (i32, i32) {
    %c0_i32 = arith.constant 0 : i32
    return %arg0, %arg2 : i32, i32
  }
  func.func @transform_1(%arg0: i32, %arg1: i32, %arg2: i32) -> (i32, i32) {
    %c0_i32 = arith.constant 0 : i32
    return %arg2, %arg1 : i32, i32
  }
  func.func @transform_2(%arg0: i32, %arg1: i32, %arg2: i32) -> (i32, i32) {
    %c0_i32 = arith.constant 0 : i32
    %c0_i32_0 = arith.constant 0 : i32
    return %arg0, %c0_i32 : i32, i32
  }
  func.func @transform_3(%arg0: i32, %arg1: i32, %arg2: i32) -> (i32, i32) {
    %c0_i32 = arith.constant 0 : i32
    return %arg0, %arg1 : i32, i32
  }
}

</mosaic_0001>

<bundles_post_ra>
// kernel: tpu_custom_call.1
= control target key start
LH: loop header
LB: loop body
LE: loop exit
PB: predicated region body
PF: predicated region fallthrough
CT: control target
= control target key end

     0   :  { %8 = vsyncpa [#allocation3], 0  ;;  %s449_s0 = inlined_call_operand.hbm [shape: f32[8,128], index: 0, kind: input, shape index: {}]   ;;  %s450_s1 = inlined_call_operand.hbm [shape: f32[128,128], index: 1, kind: input, shape index: {}]   ;;  %s451_s2 = inlined_call_operand.hbm [shape: f32[8,128], index: 2, kind: input, shape index: {}]   ;;  %s452_s3 = inlined_call_operand.hbm [shape: f32[8,128], index: 3, kind: output, shape index: {}]  }
   0x1   :  { %9 = vsyncpa [#allocation6], 0 }
   0x2   :  { %10 = vsyncpa [#allocation4], 0  ;;  %s371_s12 = smov [#allocation5]   ;;  %s277_s16 = scalar_lea.hbm %s450_s1, 2048 }
   0x3   :  { %s26_s13 = sshll.u32 %s371_s12, 4  ;;  %p278_p0 = scmp.ne.s32.totalorder %s450_s1, %s277_s16  ;;  %s27_s13 = int_to_ptr.vmem [resolvable:$true] %s26_s13 }
   0x4   :  { %p281_p1 = scmp.lt.u32.totalorder %s277_s16, %s450_s1 }
   0x6   :  { %p283_p2 = pnand %p281_p1, %p278_p0 }
   0x8   :  { %286 = shalt.err (!%p283_p2)
}
   0x9   :  { %s287_s21 = scalar_lea.vmem %s27_s13, 2048  ;;  %p292_p4 = scmp.lt.s32.totalorder %s27_s13, %s27_s13 }
   0xa   :  { %p288_p3 = scmp.ne.s32.totalorder %s27_s13, %s287_s21  ;;  %p293_p5 = scmp.lt.s32.totalorder %s287_s21, %s287_s21 }
   0xc   :  { %p294_p6 = por %p293_p5, %p292_p4 }
   0xe   :  { %p295_p7 = pnand %p294_p6, %p288_p3 }
  0x10   :  { %298 = shalt.err (!%p295_p7)
}
  0x11   :  { %s372_s22 = smov 128   ;;  %s373_s23 = smov 8  }
  0x12   :  { %32 = dma.hbm_to_vmem [thread:$0]  %s450_s1, 2048, %s27_s13, [#allocation6], %s372_s22, %s372_s22, %s373_s23  }
  0x13   :  { %s374_s26 = smov [#allocation2]   ;;  %s375_s28 = smov [#allocation7]  }
  0x14   :  { %s17_s27 = sshll.u32 %s374_s26, 4  ;;  %s39_s29 = sshll.u32 %s375_s28, 4  ;;  %s18_s27 = int_to_ptr.vmem [resolvable:$true] %s17_s27  ;;  %s40_s29 = int_to_ptr.vmem [resolvable:$true] %s39_s29 }
  0x15   :  { %s299_s5 = scalar_lea.hbm %s449_s0, 128 }
  0x16   :  { %p300_p8 = scmp.ne.s32.totalorder %s449_s0, %s299_s5  ;;  %p303_p9 = scmp.lt.u32.totalorder %s299_s5, %s449_s0 }
  0x18   :  { %p305_p10 = pnand %p303_p9, %p300_p8 }
  0x1a   :  { %308 = shalt.err (!%p305_p10)
}
  0x1b   :  { %s309_s1 = scalar_lea.vmem %s18_s27, 128  ;;  %p314_p12 = scmp.lt.s32.totalorder %s18_s27, %s18_s27 }
  0x1c   :  { %p310_p11 = scmp.ne.s32.totalorder %s18_s27, %s309_s1  ;;  %p315_p13 = scmp.lt.s32.totalorder %s309_s1, %s309_s1 }
  0x1e   :  { %p316_p0 = por %p315_p13, %p314_p12 }
  0x20   :  { %p317_p1 = pnand %p316_p0, %p310_p11 }
  0x22   :  { %320 = shalt.err (!%p317_p1)
}
  0x23   :  { %20 = dma.hbm_to_vmem [thread:$0]  %s449_s0, 128, %s18_s27, [#allocation3]  }
  0x24   :  { %s321_s14 = scalar_lea.hbm %s451_s2, 128 }
  0x25   :  { %p322_p2 = scmp.ne.s32.totalorder %s451_s2, %s321_s14  ;;  %p325_p3 = scmp.lt.u32.totalorder %s321_s14, %s451_s2 }
  0x27   :  { %p327_p4 = pnand %p325_p3, %p322_p2 }
  0x29   :  { %330 = shalt.err (!%p327_p4)
}
  0x2a   :  { %s331_s19 = scalar_lea.vmem %s40_s29, 128  ;;  %p336_p6 = scmp.lt.s32.totalorder %s40_s29, %s40_s29 }
  0x2b   :  { %p332_p5 = scmp.ne.s32.totalorder %s40_s29, %s331_s19  ;;  %p337_p7 = scmp.lt.s32.totalorder %s331_s19, %s331_s19 }
  0x2d   :  { %p338_p8 = por %p337_p7, %p336_p6 }
  0x2f   :  { %p339_p9 = pnand %p338_p8, %p332_p5 }
  0x31   :  { %342 = shalt.err (!%p339_p9)
}
  0x32   :  { %42 = dma.hbm_to_vmem [thread:$0]  %s451_s2, 128, %s40_s29, [#allocation6]  }
  0x33   :  { %365 = dma.done.wait [#allocation3], 128  }
  0x34   :  { %366 = vsyncadd [#allocation3], 4294967168 }
  0x35   :  { %367 = dma.done.wait [#allocation6], 2176  }
  0x36   :  { %368 = vsyncadd [#allocation6], 4294965120  ;;  %v376_v0 = vmov 0.0|0.0   ;;  %vm377_vm0 = vmmov 0   ;;  %v378_v1 = vmov 0.0   ;;  %v379_v2 = vmov 0  }
  0x37   :  { %238 = vmatprep.subr.bf16.mxu0 %v376_v0  ;;  %235 = vmatprep.mubr.msk.f32.mxu0 %vm377_vm0, %v378_v1  ;;  %v53_v3 = vld [vmem:[#allocation5] sm:$0xff]  ;;  %v54_v4 = vld [vmem:[#allocation5 + $0x8] sm:$0xff]  ;;  %v55_v5 = vld [vmem:[#allocation5 + $0x10] sm:$0xff]  ;;  %s380_s2 = smov [#allocation8]  }
  0x38   :  { %272 = vset.pattern.permute.xlu0 %v379_v2  ;;  %v239_v6 = vpack.c.bf16 %v54_v4, %v53_v3  ;;  %v56_v7 = vld [vmem:[#allocation5 + $0x18] sm:$0xff]  ;;  %v57_v9 = vld [vmem:[#allocation5 + $0x20] sm:$0xff]  ;;  %v58_v10 = vld [vmem:[#allocation5 + $0x28] sm:$0xff]  ;;  %s175_s21 = sshll.u32 %s380_s2, 4  ;;  %s176_s21 = int_to_ptr.vmem [resolvable:$true] %s175_s21 }
  0x39   :  { %v242_v8 = vpack.c.bf16 %v56_v7, %v55_v5  ;;  %v155_v11 = vld [vmem:[#allocation7] sm:$0xff]  ;;  %v245_v12 = vpack.c.bf16 %v58_v10, %v57_v9  ;;  %v59_v13 = vld [vmem:[#allocation5 + $0x30] sm:$0xff]  ;;  %v60_v14 = vld [vmem:[#allocation5 + $0x38] sm:$0xff]  ;;  %s343_s22 = scalar_lea.vmem %s176_s21, 128  ;;  %p348_p11 = scmp.lt.s32.totalorder %s176_s21, %s176_s21 }
  0x3a   :  { %240 = vmatpush3.bf16.msra.mxu0 %v239_v6  ;;  %158 = vperm.xlu0 %272, %v155_v11   ;;  %v248_v15 = vpack.c.bf16 %v60_v14, %v59_v13  ;;  %v61_v16 = vld [vmem:[#allocation5 + $0x40] sm:$0xff]  ;;  %v62_v17 = vld [vmem:[#allocation5 + $0x48] sm:$0xff]  ;;  %v63_v19 = vld [vmem:[#allocation5 + $0x50] sm:$0xff]  ;;  %p344_p10 = scmp.ne.s32.totalorder %s176_s21, %s343_s22  ;;  %p349_p12 = scmp.lt.s32.totalorder %s343_s22, %s343_s22 }
  0x3b   :  { %241 = vmatprep.subr.bf16.mxu0 %v376_v0  ;;  %v251_v18 = vpack.c.bf16 %v62_v17, %v61_v16  ;;  %v64_v20 = vld [vmem:[#allocation5 + $0x58] sm:$0xff]  ;;  %v65_v22 = vld [vmem:[#allocation5 + $0x60] sm:$0xff]  ;;  %v66_v23 = vld [vmem:[#allocation5 + $0x68] sm:$0xff] }
  0x3c   :  { %v254_v21 = vpack.c.bf16 %v64_v20, %v63_v19  ;;  %v257_v24 = vpack.c.bf16 %v66_v23, %v65_v22  ;;  %v67_v25 = vld [vmem:[#allocation5 + $0x70] sm:$0xff]  ;;  %v68_v26 = vld [vmem:[#allocation5 + $0x78] sm:$0xff]  ;;  %p350_p13 = por %p349_p12, %p348_p11 }
  0x3d   :  { %v260_v27 = vpack.c.bf16 %v68_v26, %v67_v25  ;;  %v52_v28 = vld [vmem:[#allocation2] sm:$0xff] }
  0x3e   :  { %243 = vmatpush3.bf16.msra.mxu0 %v242_v8  ;;  %p351_p0 = pnand %p350_p13, %p344_p10 }
  0x3f   :  { %244 = vmatprep.subr.bf16.mxu0 %v376_v0 }
  0x42   :  { %246 = vmatpush3.bf16.msra.mxu0 %v245_v12 }
  0x43   :  { %247 = vmatprep.subr.bf16.mxu0 %v376_v0 }
  0x46   :  { %249 = vmatpush3.bf16.msra.mxu0 %v248_v15 }
  0x47   :  { %250 = vmatprep.subr.bf16.mxu0 %v376_v0 }
  0x4a   :  { %252 = vmatpush3.bf16.msra.mxu0 %v251_v18 }
  0x4b   :  { %253 = vmatprep.subr.bf16.mxu0 %v376_v0 }
  0x4e   :  { %255 = vmatpush3.bf16.msra.mxu0 %v254_v21 }
  0x4f   :  { %256 = vmatprep.subr.bf16.mxu0 %v376_v0 }
  0x52   :  { %258 = vmatpush3.bf16.msra.mxu0 %v257_v24 }
  0x53   :  { %259 = vmatprep.subr.bf16.mxu0 %v376_v0 }
  0x56   :  { %261 = vmatpush3.bf16.msra.mxu0 %v260_v27 }
  0x59   :  { %236 = vmatmul.mubr.f32.vlgmr.msra.gmra.mrb[0].mxu0 %v52_v28 }
  0xb9   :  { %v159_v29 = vpop.permute.xlu0 %158 }
 0x12c   :  { %v135_v30 = vpop.f32.mrb[0].mxu0 }
 0x12d   :  { %v237_v31 = vpop.f32.mrb[1].mxu0  ;;  %v161_v32 = vadd.f32 %v159_v29, %v135_v30 }
 0x12f   :  { %v185_v33 = vmul.f32 -1.442695, %v161_v32 }
 0x131   :  { %273 = vpow2.f32 %v185_v33 }
 0x13b   :  { %v274_v34 = vpop.eup %273 }
 0x13c   :  { %v165_v35 = vadd.f32 1.0, %v274_v34 }
 0x13e   :  { %275 = vrcp.f32 %v165_v35 }
 0x148   :  { %v276_v36 = vpop.eup %275 }
 0x149   :  { %168 = vst [vmem:[#allocation8] sm:$0xff] %v276_v36 }
 0x14a   :  { %354 = shalt.err (!%p351_p0)
}
 0x14b   :  { %s355_s25 = scalar_lea.hbm %s452_s3, 128 }
 0x14c   :  { %p356_p1 = scmp.ne.s32.totalorder %s452_s3, %s355_s25  ;;  %p359_p2 = scmp.lt.u32.totalorder %s355_s25, %s452_s3 }
 0x14e   :  { %p361_p3 = pnand %p359_p2, %p356_p1 }
 0x150   :  { %364 = shalt.err (!%p361_p3)
}
 0x151   :  { %178 = dma.vmem_to_hbm [thread:$0]  %s176_s21, 128, %s452_s3, [#allocation4]  }
 0x152   :  { %369 = dma.done.wait [#allocation4], 128  }
 0x153   :  { %370 = vsyncadd [#allocation4], 4294967168 }
 0x154   :  { %182 = vsyncpa [#allocation3], 1 }
 0x155   :  { %183 = vsyncpa [#allocation6], 1 }
 0x156   :  { %184 = vsyncpa [#allocation4], 1 }

</bundles_post_ra>
